<compile_context>
chip_gen: v7x
topology: tpu7x:2x2x1
jax: 0.10.0
libtpu: 0.0.40
codegen_flags: <defaults>
</compile_context>

<pallas_src>
import jax
import jax.numpy as jnp
from jax import lax
from jax.experimental import pallas as pl
from jax.experimental.pallas import tpu as pltpu


def _simclr_kernel(gap_ref, wenc_ref, benc_ref, w1_ref, b1_ref, w2_ref, b2_ref,
                   out_ref):
    # ---- stand-in encoder tail: Linear + ReLU on pooled features
    gap = gap_ref[...]                                          # (TB, C) bf16
    feat = jnp.dot(gap, wenc_ref[...],
                   preferred_element_type=jnp.float32) + benc_ref[...]
    feat = jnp.maximum(feat, 0.0)                               # (TB, dim_mlp) f32

    # ---- projector: Linear(dim_mlp, dim_mlp) -> ReLU -> Linear(dim_mlp, out_dim)
    h1 = jnp.dot(feat.astype(w1_ref.dtype), w1_ref[...],
                 preferred_element_type=jnp.float32) + b1_ref[...]
    h1 = jnp.maximum(h1, 0.0)                                   # (TB, dim_mlp) f32
    z = jnp.dot(h1.astype(w2_ref.dtype), w2_ref[...],
                preferred_element_type=jnp.float32) + b2_ref[...]  # (TB, out_dim) f32

    # ---- F.normalize(z, dim=-1): z / clamp_min(||z||, 1e-12) via rsqrt (EUP)
    sq = jnp.sum(z * z, axis=-1, keepdims=True)
    out_ref[...] = z * lax.rsqrt(jnp.maximum(sq, 1e-24))


def simclr_forward(x_nchw, params, *, tb=128):
    """x_nchw: (B, C, H, W) float32.  Returns L2-normalized (B, out_dim) f32."""
    B, C, H, W = x_nchw.shape
    w_enc, b_enc, w1, b1, w2, b2 = params
    dim_mlp = w1.shape[0]
    out_dim = w2.shape[1]

    # Stand-in encoder front: GAP hoisted out of the kernel (plain JAX), so the
    # kernel only streams (B, C) instead of (B, C, H*W).
    gap = jnp.mean(x_nchw.reshape(B, C, H * W), axis=-1)        # (B, C) f32

    # bf16 matmul operands; accumulation and elementwise math stay f32.
    gap_bf = gap.astype(jnp.bfloat16)
    w_enc_bf = w_enc.astype(jnp.bfloat16)
    w1_bf = w1.astype(jnp.bfloat16)
    w2_bf = w2.astype(jnp.bfloat16)

    # Batch tiling: TB a multiple of 8 when tiling, or the full (small) batch.
    TB = B if B <= tb else tb
    n_tiles = pl.cdiv(B, TB)
    Bp = n_tiles * TB
    if Bp != B:
        gap_bf = jnp.pad(gap_bf, ((0, Bp - B), (0, 0)))

    def _bytes(a):
        return a.size * a.dtype.itemsize

    # Weights/biases stay resident across the batch grid (constant index_map).
    wspec = lambda shape: pl.BlockSpec(shape, lambda i: tuple(0 for _ in shape))

    # VMEM budget: double-buffered x/out tiles + resident weights, capped for v7x.
    resident = (_bytes(w_enc_bf) + _bytes(w1_bf) + _bytes(w2_bf)
                + _bytes(b_enc) + _bytes(b1) + _bytes(b2))
    streamed = 2 * (TB * C * 2 + TB * out_dim * 4)
    vmem_limit = int(min(max(2 * (resident + streamed), 16 << 20), 48 << 20))

    flops = 2 * Bp * (C * dim_mlp + dim_mlp * dim_mlp + dim_mlp * out_dim)
    bytes_accessed = (_bytes(gap_bf) + resident + Bp * out_dim * 4)

    out = pl.pallas_call(
        _simclr_kernel,
        out_shape=jax.ShapeDtypeStruct((Bp, out_dim), jnp.float32),
        grid=(n_tiles,),
        in_specs=[
            pl.BlockSpec((TB, C), lambda i: (i, 0)),            # streamed per tile
            wspec(w_enc_bf.shape),
            wspec(b_enc.shape),
            wspec(w1_bf.shape),
            wspec(b1.shape),
            wspec(w2_bf.shape),
            wspec(b2.shape),
        ],
        out_specs=pl.BlockSpec((TB, out_dim), lambda i: (i, 0)),
        compiler_params=pltpu.CompilerParams(
            dimension_semantics=("parallel",),
            vmem_limit_bytes=vmem_limit,
        ),
        cost_estimate=pl.CostEstimate(
            flops=flops, transcendentals=Bp, bytes_accessed=bytes_accessed),
    )(gap_bf, w_enc_bf, b_enc, w1_bf, b1, w2_bf, b2)

    return out[:B]


def init_params(key, in_channels, dim_mlp, out_dim):
    k = jax.random.split(key, 6)
    scale = 0.1
    w_enc = scale * jax.random.normal(k[0], (in_channels, dim_mlp), jnp.float32)
    b_enc = scale * jax.random.normal(k[1], (1, dim_mlp), jnp.float32)
    w1 = scale * jax.random.normal(k[2], (dim_mlp, dim_mlp), jnp.float32)
    b1 = scale * jax.random.normal(k[3], (1, dim_mlp), jnp.float32)
    w2 = scale * jax.random.normal(k[4], (dim_mlp, out_dim), jnp.float32)
    b2 = scale * jax.random.normal(k[5], (1, out_dim), jnp.float32)
    return (w_enc, b_enc, w1, b1, w2, b2)


if __name__ == "__main__":
    key = jax.random.PRNGKey(0)
    kx, kp = jax.random.split(key)

    B, C, H, W = 2, 4, 16, 16       # small NCHW input, like the PyTorch module
    dim_mlp = 32                    # stand-in for resnet50's fc.in_features
    out_dim = 128                   # SimCLR default out_dim

    x = jax.random.normal(kx, (B, C, H, W), jnp.float32)
    params = init_params(kp, C, dim_mlp, out_dim)

    z = jax.block_until_ready(simclr_forward(x, params))

    # sanity: shape and unit-norm rows (normalize done in f32 inside kernel)
    norms = jnp.linalg.norm(z, axis=-1)
    assert z.shape == (B, out_dim)
    assert bool(jnp.all(jnp.abs(norms - 1.0) < 1e-4))

    print("KERNEL_OK")
</pallas_src>

<mosaic_0001>
module attributes {stable_mosaic.version = 11 : i64} {
  func.func @_simclr_kernel(%arg0: i32, %arg1: memref<2x4xbf16, #tpu.memory_space<vmem>>, %arg2: memref<4x32xbf16, #tpu.memory_space<vmem>>, %arg3: memref<1x32xf32, #tpu.memory_space<vmem>>, %arg4: memref<32x32xbf16, #tpu.memory_space<vmem>>, %arg5: memref<1x32xf32, #tpu.memory_space<vmem>>, %arg6: memref<32x128xbf16, #tpu.memory_space<vmem>>, %arg7: memref<1x128xf32, #tpu.memory_space<vmem>>, %arg8: memref<2x128xf32, #tpu.memory_space<vmem>>) attributes {dimension_semantics = [#tpu.dimension_semantics<parallel>], iteration_bounds = array<i64: 1>, scalar_prefetch = 0 : i64, scratch_operands = 0 : i64, tpu.core_type = #tpu.core_type<tc>, window_params = [{transform_indices = @transform_0, window_bounds = array<i64: 2, 4>}, {pipeline_mode = #tpu.pipeline_mode<synchronous>, transform_indices = @transform_1, window_bounds = array<i64: 4, 32>}, {pipeline_mode = #tpu.pipeline_mode<synchronous>, transform_indices = @transform_2, window_bounds = array<i64: 1, 32>}, {pipeline_mode = #tpu.pipeline_mode<synchronous>, transform_indices = @transform_3, window_bounds = array<i64: 32, 32>}, {pipeline_mode = #tpu.pipeline_mode<synchronous>, transform_indices = @transform_4, window_bounds = array<i64: 1, 32>}, {pipeline_mode = #tpu.pipeline_mode<synchronous>, transform_indices = @transform_5, window_bounds = array<i64: 32, 128>}, {pipeline_mode = #tpu.pipeline_mode<synchronous>, transform_indices = @transform_6, window_bounds = array<i64: 1, 128>}, {transform_indices = @transform_7, window_bounds = array<i64: 2, 128>}]} {
    %c0 = arith.constant 0 : index
    %c0_0 = arith.constant 0 : index
    %0 = vector.load %arg1[%c0, %c0_0] : memref<2x4xbf16, #tpu.memory_space<vmem>>, vector<2x4xbf16>
    %c0_1 = arith.constant 0 : index
    %c0_2 = arith.constant 0 : index
    %1 = vector.load %arg2[%c0_1, %c0_2] : memref<4x32xbf16, #tpu.memory_space<vmem>>, vector<4x32xbf16>
    %cst = arith.constant dense<0.000000e+00> : vector<2x32xf32>
    %2 = tpu.matmul %0, %1, %cst {dimension_numbers = #tpu.dot_dimension_numbers<[1], [0], [0], [1], [0, 0, 1, 1], [], []>} : vector<2x4xbf16>, vector<4x32xbf16>, vector<2x32xf32> -> vector<2x32xf32>
    %c0_3 = arith.constant 0 : index
    %c0_4 = arith.constant 0 : index
    %3 = vector.load %arg3[%c0_3, %c0_4] : memref<1x32xf32, #tpu.memory_space<vmem>>, vector<1x32xf32>
    %4 = vector.broadcast %3 : vector<1x32xf32> to vector<2x32xf32>
    %5 = arith.addf %2, %4 : vector<2x32xf32>
    %cst_5 = arith.constant 0.000000e+00 : f32
    %6 = vector.broadcast %cst_5 : f32 to vector<2x32xf32>
    %7 = arith.maximumf %5, %6 : vector<2x32xf32>
    %8 = arith.truncf %7 : vector<2x32xf32> to vector<2x32xbf16>
    %c0_6 = arith.constant 0 : index
    %c0_7 = arith.constant 0 : index
    %9 = vector.load %arg4[%c0_6, %c0_7] : memref<32x32xbf16, #tpu.memory_space<vmem>>, vector<32x32xbf16>
    %cst_8 = arith.constant dense<0.000000e+00> : vector<2x32xf32>
    %10 = tpu.matmul %8, %9, %cst_8 {dimension_numbers = #tpu.dot_dimension_numbers<[1], [0], [0], [1], [0, 0, 1, 1], [], []>} : vector<2x32xbf16>, vector<32x32xbf16>, vector<2x32xf32> -> vector<2x32xf32>
    %c0_9 = arith.constant 0 : index
    %c0_10 = arith.constant 0 : index
    %11 = vector.load %arg5[%c0_9, %c0_10] : memref<1x32xf32, #tpu.memory_space<vmem>>, vector<1x32xf32>
    %12 = vector.broadcast %11 : vector<1x32xf32> to vector<2x32xf32>
    %13 = arith.addf %10, %12 : vector<2x32xf32>
    %cst_11 = arith.constant 0.000000e+00 : f32
    %14 = vector.broadcast %cst_11 : f32 to vector<2x32xf32>
    %15 = arith.maximumf %13, %14 : vector<2x32xf32>
    %16 = arith.truncf %15 : vector<2x32xf32> to vector<2x32xbf16>
    %c0_12 = arith.constant 0 : index
    %c0_13 = arith.constant 0 : index
    %17 = vector.load %arg6[%c0_12, %c0_13] : memref<32x128xbf16, #tpu.memory_space<vmem>>, vector<32x128xbf16>
    %cst_14 = arith.constant dense<0.000000e+00> : vector<2x128xf32>
    %18 = tpu.matmul %16, %17, %cst_14 {dimension_numbers = #tpu.dot_dimension_numbers<[1], [0], [0], [1], [0, 0, 1, 1], [], []>} : vector<2x32xbf16>, vector<32x128xbf16>, vector<2x128xf32> -> vector<2x128xf32>
    %c0_15 = arith.constant 0 : index
    %c0_16 = arith.constant 0 : index
    %19 = vector.load %arg7[%c0_15, %c0_16] : memref<1x128xf32, #tpu.memory_space<vmem>>, vector<1x128xf32>
    %20 = vector.broadcast %19 : vector<1x128xf32> to vector<2x128xf32>
    %21 = arith.addf %18, %20 : vector<2x128xf32>
    %22 = arith.mulf %21, %21 : vector<2x128xf32>
    %cst_17 = arith.constant dense<0.000000e+00> : vector<2xf32>
    %23 = vector.multi_reduction <add>, %22, %cst_17 [1] : vector<2x128xf32> to vector<2xf32>
    %24 = vector.shape_cast %23 : vector<2xf32> to vector<2x1xf32>
    %cst_18 = arith.constant 1.000000e-24 : f32
    %25 = vector.broadcast %cst_18 : f32 to vector<2x1xf32>
    %26 = arith.maximumf %24, %25 : vector<2x1xf32>
    %27 = math.rsqrt %26 : vector<2x1xf32>
    %28 = vector.broadcast %27 : vector<2x1xf32> to vector<2x128xf32>
    %29 = arith.mulf %21, %28 : vector<2x128xf32>
    %c0_19 = arith.constant 0 : index
    %c0_20 = arith.constant 0 : index
    %30 = vector.load %arg8[%c0_19, %c0_20] : memref<2x128xf32, #tpu.memory_space<vmem>>, vector<2x128xf32>
    tpu.vector_store %arg8[%c0_19, %c0_20], %29 {strides = array<i32>} : memref<2x128xf32, #tpu.memory_space<vmem>>, vector<2x128xf32>,
    return
  }
  func.func @transform_0(%arg0: i32) -> (i32, i32) {
    %c0_i32 = arith.constant 0 : i32
    %c0_i32_0 = arith.constant 0 : i32
    return %arg0, %c0_i32 : i32, i32
  }
  func.func @transform_1(%arg0: i32) -> (i32, i32) {
    %c0_i32 = arith.constant 0 : i32
    %c0_i32_0 = arith.constant 0 : i32
    %c0_i32_1 = arith.constant 0 : i32
    return %c0_i32, %c0_i32_0 : i32, i32
  }
  func.func @transform_2(%arg0: i32) -> (i32, i32) {
    %c0_i32 = arith.constant 0 : i32
    %c0_i32_0 = arith.constant 0 : i32
    %c0_i32_1 = arith.constant 0 : i32
    return %c0_i32, %c0_i32_0 : i32, i32
  }
  func.func @transform_3(%arg0: i32) -> (i32, i32) {
    %c0_i32 = arith.constant 0 : i32
    %c0_i32_0 = arith.constant 0 : i32
    %c0_i32_1 = arith.constant 0 : i32
    return %c0_i32, %c0_i32_0 : i32, i32
  }
  func.func @transform_4(%arg0: i32) -> (i32, i32) {
    %c0_i32 = arith.constant 0 : i32
    %c0_i32_0 = arith.constant 0 : i32
    %c0_i32_1 = arith.constant 0 : i32
    return %c0_i32, %c0_i32_0 : i32, i32
  }
  func.func @transform_5(%arg0: i32) -> (i32, i32) {
    %c0_i32 = arith.constant 0 : i32
    %c0_i32_0 = arith.constant 0 : i32
    %c0_i32_1 = arith.constant 0 : i32
    return %c0_i32, %c0_i32_0 : i32, i32
  }
  func.func @transform_6(%arg0: i32) -> (i32, i32) {
    %c0_i32 = arith.constant 0 : i32
    %c0_i32_0 = arith.constant 0 : i32
    %c0_i32_1 = arith.constant 0 : i32
    return %c0_i32, %c0_i32_0 : i32, i32
  }
  func.func @transform_7(%arg0: i32) -> (i32, i32) {
    %c0_i32 = arith.constant 0 : i32
    %c0_i32_0 = arith.constant 0 : i32
    return %arg0, %c0_i32 : i32, i32
  }
}

</mosaic_0001>

<bundles_post_ra>
// kernel: tpu_custom_call.1
= control target key start
LH: loop header
LB: loop body
LE: loop exit
PB: predicated region body
PF: predicated region fallthrough
CT: control target
= control target key end

     0   :  { %12 = vsyncpa [#allocation3], 0  ;;  %s592_s0 = inlined_call_operand.hbm [shape: bf16[2,4], index: 0, kind: input, shape index: {}]   ;;  %s593_s1 = inlined_call_operand.vmem [shape: bf16[4,32], index: 1, kind: input, shape index: {}]   ;;  %s594_s2 = inlined_call_operand.hbm [shape: f32[1,32], index: 2, kind: input, shape index: {}]   ;;  %s595_s3 = inlined_call_operand.hbm [shape: bf16[32,32], index: 3, kind: input, shape index: {}]   ;;  %s596_s4 = inlined_call_operand.hbm [shape: f32[1,32], index: 4, kind: input, shape index: {}]   ;;  %s597_s5 = inlined_call_operand.vmem [shape: bf16[32,128], index: 5, kind: input, shape index: {}]   ;;  %s598_s6 = inlined_call_operand.vmem [shape: f32[1,128], index: 6, kind: input, shape index: {}]   ;;  %s599_s7 = inlined_call_operand.hbm [shape: f32[2,128], index: 7, kind: output, shape index: {}]  }
   0x1   :  { %13 = vsyncpa [#allocation6], 0 }
   0x2   :  { %14 = vsyncpa [#allocation9], 0 }
   0x3   :  { %15 = vsyncpa [#allocation4], 0  ;;  %s469_s24 = smov [#allocation5]   ;;  %s470_s26 = smov [#allocation2]  }
   0x4   :  { %s34_s25 = sshll.u32 %s469_s24, 4  ;;  %s22_s27 = sshll.u32 %s470_s26, 4  ;;  %s35_s25 = int_to_ptr.vmem [resolvable:$true] %s34_s25  ;;  %s23_s27 = int_to_ptr.vmem [resolvable:$true] %s22_s27 }
   0x5   :  { %s351_s30 = scalar_lea.hbm %s594_s2, 16 }
   0x6   :  { %p352_p0 = scmp.ne.s32.totalorder %s594_s2, %s351_s30  ;;  %p355_p1 = scmp.lt.u32.totalorder %s351_s30, %s594_s2 }
   0x8   :  { %p357_p2 = pnand %p355_p1, %p352_p0 }
   0xa   :  { %360 = shalt.err (!%p357_p2)
}
   0xb   :  { %s361_s12 = scalar_lea.vmem %s35_s25, 16  ;;  %s365_s13 = scalar_lea.vmem %s35_s25, 32 }
   0xc   :  { %p362_p3 = scmp.ne.s32.totalorder %s35_s25, %s361_s12  ;;  %p366_p4 = scmp.lt.s32.totalorder %s35_s25, %s35_s25 }
   0xd   :  { %p367_p5 = scmp.lt.s32.totalorder %s365_s13, %s361_s12 }
   0xf   :  { %p368_p6 = por %p367_p5, %p366_p4 }
  0x11   :  { %p369_p7 = pnand %p368_p6, %p362_p3 }
  0x13   :  { %372 = shalt.err (!%p369_p7)
}
  0x14   :  { %37 = dma.hbm_to_vmem [thread:$0]  %s594_s2, 16, %s35_s25, [#allocation6]  }
  0x15   :  { %s373_s18 = scalar_lea.hbm %s592_s0, 16 }
  0x16   :  { %p374_p8 = scmp.ne.s32.totalorder %s592_s0, %s373_s18  ;;  %p377_p9 = scmp.lt.u32.totalorder %s373_s18, %s592_s0 }
  0x18   :  { %p379_p10 = pnand %p377_p9, %p374_p8 }
  0x1a   :  { %382 = shalt.err (!%p379_p10)
}
  0x1b   :  { %s383_s23 = scalar_lea.vmem %s23_s27, 16  ;;  %s387_s24 = scalar_lea.vmem %s23_s27, 32 }
  0x1c   :  { %p384_p11 = scmp.ne.s32.totalorder %s23_s27, %s383_s23  ;;  %p388_p12 = scmp.lt.s32.totalorder %s23_s27, %s23_s27 }
  0x1d   :  { %p389_p13 = scmp.lt.s32.totalorder %s387_s24, %s383_s23 }
  0x1f   :  { %p390_p0 = por %p389_p13, %p388_p12 }
  0x21   :  { %p391_p1 = pnand %p390_p0, %p384_p11 }
  0x23   :  { %394 = shalt.err (!%p391_p1)
}
  0x24   :  { %25 = dma.hbm_to_vmem [thread:$0]  %s592_s0, 16, %s23_s27, [#allocation3]  }
  0x25   :  { %s471_s26 = smov [#allocation7]   ;;  %s395_s8 = scalar_lea.hbm %s595_s3, 256 }
  0x26   :  { %s43_s28 = sshll.u32 %s471_s26, 4  ;;  %p396_p2 = scmp.ne.s32.totalorder %s595_s3, %s395_s8  ;;  %s44_s28 = int_to_ptr.vmem [resolvable:$true] %s43_s28 }
  0x27   :  { %p399_p3 = scmp.lt.u32.totalorder %s395_s8, %s595_s3 }
  0x29   :  { %p401_p4 = pnand %p399_p3, %p396_p2 }
  0x2b   :  { %404 = shalt.err (!%p401_p4)
}
  0x2c   :  { %s405_s13 = scalar_lea.vmem %s44_s28, 256  ;;  %p410_p6 = scmp.lt.s32.totalorder %s44_s28, %s44_s28 }
  0x2d   :  { %p406_p5 = scmp.ne.s32.totalorder %s44_s28, %s405_s13  ;;  %p411_p7 = scmp.lt.s32.totalorder %s405_s13, %s405_s13 }
  0x2f   :  { %p412_p8 = por %p411_p7, %p410_p6 }
  0x31   :  { %p413_p9 = pnand %p412_p8, %p406_p5 }
  0x33   :  { %416 = shalt.err (!%p413_p9)
}
  0x34   :  { %s472_s0 = smov 64   ;;  %s473_s27 = smov 4  }
  0x35   :  { %49 = dma.hbm_to_vmem [thread:$0]  %s595_s3, 256, %s44_s28, [#allocation6], %s472_s0, %s472_s0, %s473_s27  }
  0x36   :  { %s474_s16 = smov [#allocation8]   ;;  %s417_s20 = scalar_lea.hbm %s596_s4, 16 }
  0x37   :  { %s56_s17 = sshll.u32 %s474_s16, 4  ;;  %p418_p10 = scmp.ne.s32.totalorder %s596_s4, %s417_s20  ;;  %s57_s17 = int_to_ptr.vmem [resolvable:$true] %s56_s17 }
  0x38   :  { %p421_p11 = scmp.lt.u32.totalorder %s417_s20, %s596_s4 }
  0x3a   :  { %p423_p12 = pnand %p421_p11, %p418_p10 }
  0x3c   :  { %426 = shalt.err (!%p423_p12)
}
  0x3d   :  { %s427_s2 = scalar_lea.vmem %s57_s17, 16  ;;  %s431_s3 = scalar_lea.vmem %s57_s17, 32 }
  0x3e   :  { %p428_p13 = scmp.ne.s32.totalorder %s57_s17, %s427_s2  ;;  %p432_p0 = scmp.lt.s32.totalorder %s57_s17, %s57_s17 }
  0x3f   :  { %p433_p1 = scmp.lt.s32.totalorder %s431_s3, %s427_s2 }
  0x41   :  { %p434_p2 = por %p433_p1, %p432_p0 }
  0x43   :  { %p435_p3 = pnand %p434_p2, %p428_p13 }
  0x45   :  { %438 = shalt.err (!%p435_p3)
}
  0x46   :  { %59 = dma.hbm_to_vmem [thread:$0]  %s596_s4, 16, %s57_s17, [#allocation9]  }
  0x47   :  { %461 = dma.done.wait [#allocation3], 16  }
  0x48   :  { %462 = vsyncadd [#allocation3], 4294967280 }
  0x49   :  { %463 = dma.done.wait [#allocation6], 272  }
  0x4a   :  { %464 = vsyncadd [#allocation6], 4294967024 }
  0x4b   :  { %465 = dma.done.wait [#allocation9], 16  }
  0x4c   :  { %466 = vsyncadd [#allocation9], 4294967280  ;;  %v475_v0 = vmov 0.0   ;;  %vm476_vm0 = vmmov 0   ;;  %vm90_vm1 = vcmask 1041408   ;;  %vm86_vm2 = vcmask 31744  }
  0x4d   :  { %314 = vmatprep.subr.bf16.mxu0 %v475_v0  ;;  %316 = vmatprep.mubr.msk.bf16.mxu0 %vm476_vm0, %v475_v0  ;;  %v78_v1 = vld [vmem:[%s593_s1] sm:$0x3]  ;;  %v77_v2 = vld [vmem:[#allocation2] sm:$0x1]  ;;  %v346_v5 = vld [vmem:[#allocation7 + $0x8] sm:$0xff]   ;;  %vm159_vm3 = vcmask 261120  }
  0x4e   :  { %320 = vmatprep.subr.bf16.mxu1 %v475_v0  ;;  %324 = vmatprep.mubr.msk.bf16.mxu1 %vm476_vm0, %v475_v0  ;;  %v92_v3 = vsel %vm90_vm1, %v78_v1, 0  ;;  %v345_v4 = vld [vmem:[#allocation7] sm:$0xff]   ;;  %v296_v7 = vld [vmem:[#allocation5] ss:$0 sm:$0xff]  ;;  %v348_v15 = vld [vmem:[%s597_s5 + $0x8] sm:$0xff]  }
  0x4f   :  { %315 = vmatpush3.bf16.msra.mxu0 %v92_v3  ;;  %321 = vmatpush3.bf16.msra.mxu1 %v345_v4  ;;  %v347_v6 = vld [vmem:[%s597_s5] sm:$0xff]   ;;  %v298_v16 = vld [vmem:[#allocation8] ss:$0 sm:$0xff]  ;;  %s477_s5 = smov [#allocation10]  }
  0x50   :  { %328 = vmatprep.subr.bf16.mxu0 %v475_v0  ;;  %322 = vmatprep.subr.bf16.mxu1 %v475_v0  ;;  %v302_v24 = vld [vmem:[%s598_s6] ss:$0 sm:$0xff]  ;;  %s285_s11 = sshll.u32 %s477_s5, 4  ;;  %s286_s11 = int_to_ptr.vmem [resolvable:$true] %s285_s11 }
  0x51   :  { %s439_s12 = scalar_lea.vmem %s286_s11, 32  ;;  %p444_p5 = scmp.lt.s32.totalorder %s286_s11, %s286_s11 }
  0x52   :  { %317 = vmatmul.mubr.msk.bf16.vlgmr.msra.gmra.mrb[0].mxu0 %vm86_vm2, %v77_v2  ;;  %p440_p4 = scmp.ne.s32.totalorder %s286_s11, %s439_s12  ;;  %p445_p6 = scmp.lt.s32.totalorder %s439_s12, %s439_s12 }
  0x53   :  { %332 = vmatprep.mubr.msk.bf16.mxu0 %vm476_vm0, %v475_v0  ;;  %323 = vmatpush3.bf16.msra.mxu1 %v346_v5 }
  0x54   :  { %329 = vmatpush3.bf16.msra.mxu0 %v347_v6  ;;  %p446_p7 = por %p445_p6, %p444_p5 }
  0x55   :  { %330 = vmatprep.subr.bf16.mxu0 %v475_v0 }
  0x56   :  { %p447_p8 = pnand %p446_p7, %p440_p4 }
  0x58   :  { %331 = vmatpush3.bf16.msra.mxu0 %v348_v15 }
 0x125   :  { %v128_v8 = vpop.f32.mrb[0].mxu0 }
 0x126   :  { %v129_v9 = vadd.f32 %v296_v7, %v128_v8  ;;  %v318_v10 = vpop.f32.mrb[1].mxu0 }
 0x127   :  { %v131_v11 = vpop.f32.mrb[2].mxu0 }
 0x128   :  { %v134_v12 = vmax.f32 %v129_v9, 0.0  ;;  %v319_v13 = vpop.f32.mrb[3].mxu0 }
 0x12a   :  { %v135_v14 = vpack.c.bf16 %v134_v12, %v134_v12 }
 0x12c   :  { %325 = vmatmul.mubr.msk.bf16.vlgmr.msra.gmra.mrb[0].mxu1 %vm159_vm3, %v135_v14 }
 0x1ff   :  { %v197_v17 = vpop.f32.mrb[0].mxu1 }
 0x200   :  { %v198_v18 = vadd.f32 %v298_v16, %v197_v17  ;;  %v326_v19 = vpop.f32.mrb[1].mxu1 }
 0x201   :  { %v200_v20 = vpop.f32.mrb[2].mxu1 }
 0x202   :  { %v203_v21 = vmax.f32 %v198_v18, 0.0  ;;  %v327_v22 = vpop.f32.mrb[3].mxu1 }
 0x204   :  { %v204_v23 = vpack.c.bf16 %v203_v21, %v203_v21 }
 0x206   :  { %333 = vmatmul.mubr.msk.bf16.vlgmr.msra.gmra.mrb[4].mxu0 %vm159_vm3, %v204_v23 }
 0x2d9   :  { %v265_v25 = vpop.f32.mrb[4].mxu0 }
 0x2da   :  { %v266_v26 = vadd.f32 %v302_v24, %v265_v25  ;;  %v334_v27 = vpop.f32.mrb[5].mxu0 }
 0x2db   :  { %v268_v28 = vpop.f32.mrb[6].mxu0 }
 0x2dc   :  { %v335_v29 = vpop.f32.mrb[7].mxu0  ;;  %v271_v30 = vmul.f32 %v266_v26, %v266_v26 }
 0x2de   :  { %v272_v31 = vsel %vm90_vm1, %v271_v30, 0.0 }
 0x2df   :  { %273 = vadd.xlane.f32.xlu0 %v272_v31 }
 0x36c   :  { %v274_v32 = vpop.xlane.xlu0 %273 }
 0x36d   :  { %v275_v33 = vmax.f32 %v274_v32, 1e-24 }
 0x36f   :  { %349 = vrsqrt.f32 %v275_v33 }
 0x379   :  { %v350_v34 = vpop.eup %349 }
 0x37a   :  { %v277_v35 = vmul.f32 %v350_v34, %v266_v26 }
 0x37c   :  { %278 = vst [vmem:[#allocation10] sm:$0x3] %v277_v35 }
 0x37d   :  { %450 = shalt.err (!%p447_p8)
}
 0x37e   :  { %s451_s0 = scalar_lea.hbm %s599_s7, 32 }
 0x37f   :  { %p452_p9 = scmp.ne.s32.totalorder %s599_s7, %s451_s0  ;;  %p455_p10 = scmp.lt.u32.totalorder %s451_s0, %s599_s7 }
 0x381   :  { %p457_p11 = pnand %p455_p10, %p452_p9 }
 0x383   :  { %460 = shalt.err (!%p457_p11)
}
 0x384   :  { %288 = dma.vmem_to_hbm [thread:$0]  %s286_s11, 32, %s599_s7, [#allocation4]  }
 0x385   :  { %467 = dma.done.wait [#allocation4], 32  }
 0x386   :  { %468 = vsyncadd [#allocation4], 4294967264 }
 0x387   :  { %292 = vsyncpa [#allocation3], 1 }
 0x388   :  { %293 = vsyncpa [#allocation6], 1 }
 0x389   :  { %294 = vsyncpa [#allocation9], 1 }
 0x38a   :  { %295 = vsyncpa [#allocation4], 1 }

</bundles_post_ra>
